<compile_context>
chip_gen: v7x
topology: tpu7x:2x2x1
jax: 0.10.0
libtpu: 0.0.40
codegen_flags: <defaults>
</compile_context>

<pallas_src>
import jax
import jax.numpy as jnp
from jax.experimental import pallas as pl
from jax.experimental.pallas import tpu as pltpu


def _linear_kernel(x_ref, wb_ref, o_ref):
    """y = x @ W + b, where wb_ref = [W ; b] with the bias as the last row."""
    d = wb_ref.shape[0] - 1                         # static slice boundary
    acc = jnp.dot(x_ref[...], wb_ref[:d, :],        # MXU, f32 accumulate
                  preferred_element_type=jnp.float32)
    o_ref[...] = (acc + wb_ref[d:, :]).astype(o_ref.dtype)   # bias row (VPU)


def prepare_simple_nn_params(weight, bias, *, pack=4):
    """One-time parameter prep (hoisted out of the per-call forward path).

    weight: [O, D] (PyTorch nn.Linear layout), bias: [O]
    Returns (wb, wbp):
      wb  : [D+1, O]          plain weight^T with bias as last row
      wbp : [pack*D+1, pack*O] block-diagonal packed weight (lane-dense path)
            with the pack-times-tiled bias as last row
    """
    O, D = weight.shape
    wt = jnp.asarray(weight, jnp.float32).T                      # [D, O]
    b = jnp.asarray(bias, jnp.float32)
    wb = jnp.concatenate([wt, b.reshape(1, O)], axis=0)          # [D+1, O]

    # Block-diagonal [pack*D, pack*O]: rows p*D..p*D+D-1 map to cols p*O..p*O+O-1.
    w_block = jnp.kron(jnp.eye(pack, dtype=wt.dtype), wt)        # [pack*D, pack*O]
    b_tiled = jnp.tile(b, pack).reshape(1, pack * O)             # [1, pack*O]
    wbp = jnp.concatenate([w_block, b_tiled], axis=0)            # [pack*D+1, pack*O]
    return wb, wbp


def simple_nn_forward(x, params, *, block_rows=16384, tiny_batch=1024):
    """nn.Linear forward: y = x @ weight.T + bias.

    x:      [B, D] float32
    params: (wb, wbp) from prepare_simple_nn_params
    returns [B, O] float32
    """
    wb, wbp = params
    B, D = x.shape
    O = wb.shape[1]
    pack = wbp.shape[1] // O

    # ---- tiny / overhead-bound path: whole problem in one VMEM block, no grid.
    if B <= tiny_batch:
        return pl.pallas_call(
            _linear_kernel,
            out_shape=jax.ShapeDtypeStruct((B, O), x.dtype),
            in_specs=[
                pl.BlockSpec(memory_space=pltpu.MemorySpace.VMEM),
                pl.BlockSpec(memory_space=pltpu.MemorySpace.VMEM),
            ],
            out_specs=pl.BlockSpec(memory_space=pltpu.MemorySpace.VMEM),
        )(x, wb)

    compiler_params = pltpu.CompilerParams(
        dimension_semantics=("parallel",),        # v7x: split batch across 2 TCs
        vmem_limit_bytes=48 * 1024 * 1024,        # > v5e 16 MiB default, < v7x 64 MiB
    )

    # ---- lane-dense packed path (4 feature rows per 128-lane vreg row).
    if B % pack == 0 and (D * pack) % 128 == 0:
        Bp, Dp, Op = B // pack, D * pack, O * pack
        xp = x.reshape(Bp, Dp)                    # free row-major reshape
        block_bp = min(max(block_rows // pack, 8), Bp)
        block_bp = max(8, (block_bp // 8) * 8)
        nb = pl.cdiv(Bp, block_bp)                # partial edge block, no jnp.pad
        out = pl.pallas_call(
            _linear_kernel,
            out_shape=jax.ShapeDtypeStruct((Bp, Op), x.dtype),
            grid=(nb,),
            in_specs=[
                pl.BlockSpec((block_bp, Dp), lambda i: (i, 0)),   # streamed x tiles
                pl.BlockSpec((Dp + 1, Op), lambda i: (0, 0)),     # resident weight+bias
            ],
            out_specs=pl.BlockSpec((block_bp, Op), lambda i: (i, 0)),
            compiler_params=compiler_params,
        )(xp, wbp)
        return out.reshape(B, O)                  # free row-major reshape back

    # ---- fallback tiled path (B not divisible by pack): plain [B, D] stream.
    block_b = min(block_rows, B)
    block_b = max(8, (block_b // 8) * 8)
    nb = pl.cdiv(B, block_b)                      # partial edge block, no jnp.pad
    return pl.pallas_call(
        _linear_kernel,
        out_shape=jax.ShapeDtypeStruct((B, O), x.dtype),
        grid=(nb,),
        in_specs=[
            pl.BlockSpec((block_b, D), lambda i: (i, 0)),
            pl.BlockSpec((D + 1, O), lambda i: (0, 0)),
        ],
        out_specs=pl.BlockSpec((block_b, O), lambda i: (i, 0)),
        compiler_params=compiler_params,
    )(x, wb)


if __name__ == "__main__":
    key = jax.random.PRNGKey(0)
    k_x, k_w, k_b, k_x2, k_x3 = jax.random.split(key, 5)

    input_dim = 32        # X_train.shape[1] in the reference script
    out_features = 2      # nn.Linear(input_dim, 2)

    # Deterministic init mimicking nn.Linear default:
    # U(-1/sqrt(input_dim), 1/sqrt(input_dim)) for weight and bias.
    bound = 1.0 / (input_dim ** 0.5)
    weight = jax.random.uniform(
        k_w, (out_features, input_dim), jnp.float32, -bound, bound)
    bias = jax.random.uniform(
        k_b, (out_features,), jnp.float32, -bound, bound)

    params = prepare_simple_nn_params(weight, bias)   # once per set of weights

    # --- tiny / overhead-bound path (no grid) ---
    x_small = jax.random.normal(k_x, (8, input_dim), jnp.float32)
    y_small = jax.block_until_ready(simple_nn_forward(x_small, params))
    assert y_small.shape == (8, out_features)
    assert jnp.allclose(y_small, x_small @ weight.T + bias, atol=1e-5, rtol=1e-5)

    # --- lane-dense packed path (B % 4 == 0; ragged edge block, multi-step grid) ---
    x_big = jax.random.normal(k_x2, (8200, input_dim), jnp.float32)
    y_big = jax.block_until_ready(simple_nn_forward(x_big, params))
    assert y_big.shape == (8200, out_features)
    assert jnp.allclose(y_big, x_big @ weight.T + bias, atol=1e-5, rtol=1e-5)

    # --- fallback tiled path (B % 4 != 0; ragged edge block, no jnp.pad) ---
    x_rag = jax.random.normal(k_x3, (1030, input_dim), jnp.float32)
    y_rag = jax.block_until_ready(simple_nn_forward(x_rag, params))
    assert y_rag.shape == (1030, out_features)
    assert jnp.allclose(y_rag, x_rag @ weight.T + bias, atol=1e-5, rtol=1e-5)

    print("KERNEL_OK")
</pallas_src>

<mosaic_0001>
module attributes {stable_mosaic.version = 11 : i64} {
  func.func @_linear_kernel(%arg0: memref<8x32xf32, #tpu.memory_space<vmem>>, %arg1: memref<33x2xf32, #tpu.memory_space<vmem>>, %arg2: memref<8x2xf32, #tpu.memory_space<vmem>>) attributes {dimension_semantics = [], scalar_prefetch = 0 : i64, scratch_operands = 0 : i64, tpu.core_type = #tpu.core_type<tc>} {
    %c0 = arith.constant 0 : index
    %c0_0 = arith.constant 0 : index
    %0 = vector.load %arg0[%c0, %c0_0] : memref<8x32xf32, #tpu.memory_space<vmem>>, vector<8x32xf32>
    %c0_1 = arith.constant 0 : index
    %c0_2 = arith.constant 0 : index
    %1 = vector.load %arg1[%c0_1, %c0_2] : memref<33x2xf32, #tpu.memory_space<vmem>>, vector<32x2xf32>
    %cst = arith.constant dense<0.000000e+00> : vector<8x2xf32>
    %2 = tpu.matmul %0, %1, %cst {dimension_numbers = #tpu.dot_dimension_numbers<[1], [0], [0], [1], [0, 0, 1, 1], [], []>} : vector<8x32xf32>, vector<32x2xf32>, vector<8x2xf32> -> vector<8x2xf32>
    %c32 = arith.constant 32 : index
    %c0_3 = arith.constant 0 : index
    %3 = vector.load %arg1[%c32, %c0_3] : memref<33x2xf32, #tpu.memory_space<vmem>>, vector<1x2xf32>
    %4 = vector.broadcast %3 : vector<1x2xf32> to vector<8x2xf32>
    %5 = arith.addf %2, %4 : vector<8x2xf32>
    %c0_4 = arith.constant 0 : index
    %c0_5 = arith.constant 0 : index
    %6 = vector.load %arg2[%c0_4, %c0_5] : memref<8x2xf32, #tpu.memory_space<vmem>>, vector<8x2xf32>
    tpu.vector_store %arg2[%c0_4, %c0_5], %5 {strides = array<i32>} : memref<8x2xf32, #tpu.memory_space<vmem>>, vector<8x2xf32>,
    return
  }
}

</mosaic_0001>

<bundles_post_ra>
// kernel: tpu_custom_call.1
= control target key start
LH: loop header
LB: loop body
LE: loop exit
PB: predicated region body
PF: predicated region fallthrough
CT: control target
= control target key end

     0   :  { %v128_v0 = vmov 0.0|0.0   ;;  %vm129_vm0 = vmmov 0   ;;  %v130_v4 = vmov 0.0   ;;  %vm21_vm1 = vcmask 261120   ;;  %s167_s1 = inlined_call_operand.vmem [shape: f32[33,2], index: 1, kind: input, shape index: {}]   ;;  %s168_s0 = inlined_call_operand.vmem [shape: f32[8,32], index: 0, kind: input, shape index: {}]   ;;  %s169_s2 = inlined_call_operand.vmem [shape: f32[8,2], index: 2, kind: output, shape index: {}]  }
   0x1   :  { %119 = vmatprep.subr.bf16.mxu0 %v128_v0  ;;  %v12_v1 = vld [vmem:[%s167_s1] sm:$0xff]  ;;  %v13_v2 = vld [vmem:[%s167_s1 + $0x8] sm:$0xff]  ;;  %v14_v3 = vld [vmem:[%s167_s1 + $0x10] sm:$0xff]  ;;  %116 = vmatprep.mubr.msk.f32.mxu0 %vm129_vm0, %v130_v4  ;;  %vm95_vm2 = vcmask 15360  }
   0x2   :  { %v120_v5 = vpack.c.bf16 %v13_v2, %v12_v1  ;;  %v15_v6 = vld [vmem:[%s167_s1 + $0x18] sm:$0xff]  ;;  %v11_v8 = vld [vmem:[%s168_s0] sm:$0xff] }
   0x3   :  { %v123_v7 = vpack.c.bf16 %v15_v6, %v14_v3  ;;  %v101_v9 = vld [vmem:[%s167_s1 + $0x20] ss:$0 sm:$0xff] }
   0x4   :  { %121 = vmatpush3.bf16.msra.mxu0 %v120_v5 }
   0x5   :  { %122 = vmatprep.subr.bf16.mxu0 %v128_v0 }
   0x8   :  { %124 = vmatpush3.bf16.msra.mxu0 %v123_v7 }
   0xb   :  { %117 = vmatmul.mubr.msk.f32.vlgmr.msra.gmra.mrb[0].mxu0 %vm21_vm1, %v11_v8 }
  0xde   :  { %v91_v10 = vpop.f32.mrb[0].mxu0 }
  0xdf   :  { %v92_v11 = vadd.f32 %v101_v9, %v91_v10  ;;  %v118_v12 = vpop.f32.mrb[1].mxu0 }
  0xe1   :  { %96 = vst.msk [vmem:[%s169_s2] sm:$0xff] %vm95_vm2, %v92_v11 }

</bundles_post_ra>
